<compile_context>
chip_gen: v5e
topology: v5e:2x2
jax: 0.10.0
libtpu: 0.0.40
codegen_flags: <defaults>
</compile_context>

<pallas_src>
import functools

import jax
import jax.numpy as jnp
from jax import lax
from jax.experimental import pallas as pl
from jax.experimental.pallas import tpu as pltpu

# Layer widths of the PyTorch module: 3 -> 64 -> 32 -> 16 -> 8 -> 6
_DIMS = (3, 64, 32, 16, 8, 6)
_N_LAYERS = len(_DIMS) - 1


def _round_up(n, m):
    return (n + m - 1) // m * m


# ---------------------------------------------------------------------------
# Parameter slab: one bf16 array holding all weights and biases.
#   layers 0..3 : W_l stored (out_l, in_l)  rows [_W_OFFS[l], +out_l), cols [0,in_l)
#                 b_l stored as a column    rows [_B_OFFS[l], +out_l), col 0
#                 (a column broadcasts over the lane/batch axis of the
#                  feature-major activations)
#   layer 4     : W_5 stored TRANSPOSED (in=8, out=6) and b_5 stored as a row,
#                 because fc5 is evaluated batch-major so its result lands
#                 directly in the (bb, 6) output-block layout.
# Row offsets are multiples of 16 (bf16 sublane tile) so every slice starts on
# a tile boundary.
# ---------------------------------------------------------------------------
_ALIGN = 16
_W_OFFS, _B_OFFS = [], []
_r = 0
for _l in range(_N_LAYERS):
    _W_OFFS.append(_r)
    _rows = _DIMS[_l] if _l == _N_LAYERS - 1 else _DIMS[_l + 1]   # fc5: (in, out)
    _r += _round_up(_rows, _ALIGN)
for _l in range(_N_LAYERS):
    _B_OFFS.append(_r)
    _rows = 1 if _l == _N_LAYERS - 1 else _DIMS[_l + 1]           # fc5 bias: a row
    _r += _round_up(_rows, _ALIGN)
_SLAB_ROWS = _round_up(_r, _ALIGN)   # 288
_SLAB_COLS = 64                      # max fan-in (fc2) is 64

# dot_general dimension numbers (2-D, no batch dims).
_NN = (((1,), (0,)), ((), ()))   # A @ B     (standard)
_NT = (((1,), (1,)), ((), ()))   # A @ B^T   (contract last dim of both)


def _mlp_kernel(x_ref, p_ref, o_ref):
    # x_ref: (bb, 3)  batch-major input block  (full last dim -> contiguous DMA)
    # p_ref: (288, 64) bf16 parameter slab, constant index_map -> one DMA,
    #        VMEM-resident across all grid steps.
    # o_ref: (bb, 6)  batch-major output block (full last dim -> contiguous DMA)
    f32, bf16 = jnp.float32, jnp.bfloat16
    x = x_ref[...].astype(f32)                                       # (bb, 3)

    # fc1: contract the size-3 dim of x directly (A @ B^T) -> feature-major
    # (64, bb): batch on the lane axis, so every bias-add / ReLU below runs on
    # dense [8,128] vregs and no explicit input transpose is needed.  K=3 barely
    # uses the MXU, but the MXU is otherwise idle here.
    w1 = p_ref[_W_OFFS[0]:_W_OFFS[0] + _DIMS[1], 0:_DIMS[0]].astype(f32)   # (64, 3)
    b1 = p_ref[_B_OFFS[0]:_B_OFFS[0] + _DIMS[1], 0:1].astype(f32)          # (64, 1)
    h = lax.dot_general(w1, x, _NT, preferred_element_type=f32) + b1
    h = jnp.maximum(h, 0.0)                                          # (64, bb)

    # fc2..fc4: standard feature-major matmuls, bf16 operands, f32 accumulate.
    for l in (1, 2, 3):
        in_d, out_d = _DIMS[l], _DIMS[l + 1]
        w = p_ref[_W_OFFS[l]:_W_OFFS[l] + out_d, 0:in_d]             # (out, in) bf16
        b = p_ref[_B_OFFS[l]:_B_OFFS[l] + out_d, 0:1].astype(f32)    # (out, 1)
        h = lax.dot_general(w, h.astype(bf16), _NN,
                            preferred_element_type=f32) + b
        h = jnp.maximum(h, 0.0)                                      # (out, bb)

    # fc5 (no ReLU): flip to batch-major with one tile-aligned f32 transpose
    # ((8, bb) -> (bb, 8), XLU slot), then a plain NN dot against the
    # transposed-stored W5 (8, 6) -> result (bb, 6) stores straight to o_ref.
    hb = h.T                                                         # (bb, 8) f32
    w5t = p_ref[_W_OFFS[4]:_W_OFFS[4] + _DIMS[4], 0:_DIMS[5]].astype(f32)  # (8, 6)
    b5 = p_ref[_B_OFFS[4]:_B_OFFS[4] + 1, 0:_DIMS[5]].astype(f32)          # (1, 6)
    o = jnp.dot(hb, w5t, preferred_element_type=f32) + b5            # (bb, 6)
    o_ref[...] = o.astype(o_ref.dtype)


@functools.partial(jax.jit, static_argnames=("block_b", "num_cores"))
def mlp_forward(x, param_slab, *, block_b=4096, num_cores=1):
    """x: (B, 3); param_slab: (288, 64) bf16 from pack_params(). Returns (B, 6).

    block_b:   batch rows per grid step (~13 MiB VMEM at 4096; 8192 needs a
               vmem_limit_bytes raise).
    num_cores: TensorCores per chip (1 on v5e/v6e, 2 on v7x) -- only used to keep
               the block count a multiple of the core count so no core idles.
    """
    B, d_in = x.shape
    assert d_in == _DIMS[0]
    d_out = _DIMS[-1]

    bb = max(128, min(int(block_b), _round_up(B, 128)))
    if num_cores > 1:
        # v7x: even out work across TensorCores.
        # TODO(synk): verify "parallel" actually shards across v7x cores; if not,
        # switch to pltpu.CORE_PARALLEL / an explicit core_map.
        n_blk = _round_up(pl.cdiv(B, bb), num_cores)
        bb = max(128, _round_up(pl.cdiv(B, n_blk), 128))
    grid = (pl.cdiv(B, bb),)   # ragged last block: OOB reads are garbage rows,
                               # OOB writes are masked by Pallas (rows independent)

    return pl.pallas_call(
        _mlp_kernel,
        out_shape=jax.ShapeDtypeStruct((B, d_out), x.dtype),
        grid_spec=pltpu.PrefetchScalarGridSpec(
            num_scalar_prefetch=0,
            grid=grid,
            in_specs=[
                pl.BlockSpec((bb, d_in), lambda i: (i, 0)),
                # Whole slab, constant block index -> fetched once, stays resident.
                pl.BlockSpec((_SLAB_ROWS, _SLAB_COLS), lambda i: (0, 0)),
            ],
            out_specs=pl.BlockSpec((bb, d_out), lambda i: (i, 0)),
        ),
        compiler_params=pltpu.CompilerParams(
            dimension_semantics=("parallel",)),
    )(x, param_slab)


def init_params(key):
    """PyTorch nn.Linear-style init: W (out, in), b (out,), U(+/- 1/sqrt(fan_in))."""
    params = []
    for l in range(_N_LAYERS):
        fan_in, fan_out = _DIMS[l], _DIMS[l + 1]
        key, kw, kb = jax.random.split(key, 3)
        bound = 1.0 / float(fan_in) ** 0.5
        w = jax.random.uniform(kw, (fan_out, fan_in), jnp.float32, -bound, bound)
        b = jax.random.uniform(kb, (fan_out,), jnp.float32, -bound, bound)
        params.append((w, b))
    return params


def pack_params(params):
    """Pack the 5 (W, b) pairs into one (288, 64) bf16 slab (host side, once)."""
    slab = jnp.zeros((_SLAB_ROWS, _SLAB_COLS), jnp.float32)
    for l, (w, b) in enumerate(params):
        out_d, in_d = w.shape
        if l == _N_LAYERS - 1:   # fc5: W transposed (in, out), bias as a row
            slab = slab.at[_W_OFFS[l]:_W_OFFS[l] + in_d, :out_d].set(w.T)
            slab = slab.at[_B_OFFS[l], :out_d].set(b)
        else:
            slab = slab.at[_W_OFFS[l]:_W_OFFS[l] + out_d, :in_d].set(w)
            slab = slab.at[_B_OFFS[l]:_B_OFFS[l] + out_d, 0].set(b)
    return slab.astype(jnp.bfloat16)


def reference_forward(x, params):
    """Pure-JAX f32 reference matching the PyTorch forward exactly."""
    h = x
    for l, (w, b) in enumerate(params):
        h = h @ w.T + b
        if l < _N_LAYERS - 1:
            h = jnp.maximum(h, 0.0)
    return h


if __name__ == "__main__":
    key = jax.random.PRNGKey(0)
    kp, kx = jax.random.split(key)
    params = init_params(kp)
    slab = pack_params(params)

    # Small accelerometer-style batch of (x, y, z) samples; deliberately not a
    # multiple of 128 to exercise the masked ragged-block path.
    B = 200
    x = jax.random.normal(kx, (B, 3), jnp.float32)

    out = jax.block_until_ready(mlp_forward(x, slab))

    ref = reference_forward(x, params)
    assert out.shape == (B, _DIMS[-1])
    # bf16 weights / bf16 MXU operands (f32 accumulation) vs. the f32 reference.
    assert jnp.allclose(out, ref, atol=5e-2, rtol=5e-2), "mismatch vs reference"

    print("KERNEL_OK")
</pallas_src>

<mosaic_0001>
module attributes {stable_mosaic.version = 11 : i64} {
  func.func @_mlp_kernel(%arg0: i32, %arg1: memref<256x3xf32, #tpu.memory_space<vmem>>, %arg2: memref<288x64xbf16, #tpu.memory_space<vmem>>, %arg3: memref<256x6xf32, #tpu.memory_space<vmem>>) attributes {dimension_semantics = [#tpu.dimension_semantics<parallel>], iteration_bounds = array<i64: 1>, scalar_prefetch = 0 : i64, scratch_operands = 0 : i64, tpu.core_type = #tpu.core_type<tc>, window_params = [{transform_indices = @transform_0, window_bounds = array<i64: 256, 3>}, {pipeline_mode = #tpu.pipeline_mode<synchronous>, transform_indices = @transform_1, window_bounds = array<i64: 288, 64>}, {transform_indices = @transform_2, window_bounds = array<i64: 256, 6>}]} {
    %c0 = arith.constant 0 : index
    %c0_0 = arith.constant 0 : index
    %0 = vector.load %arg1[%c0, %c0_0] : memref<256x3xf32, #tpu.memory_space<vmem>>, vector<256x3xf32>
    %c0_1 = arith.constant 0 : index
    %c0_2 = arith.constant 0 : index
    %1 = vector.load %arg2[%c0_1, %c0_2] : memref<288x64xbf16, #tpu.memory_space<vmem>>, vector<64x3xbf16>
    %2 = arith.extf %1 : vector<64x3xbf16> to vector<64x3xf32>
    %c144 = arith.constant 144 : index
    %c0_3 = arith.constant 0 : index
    %3 = vector.load %arg2[%c144, %c0_3] : memref<288x64xbf16, #tpu.memory_space<vmem>>, vector<64x1xbf16>
    %4 = arith.extf %3 : vector<64x1xbf16> to vector<64x1xf32>
    %cst = arith.constant dense<0.000000e+00> : vector<64x256xf32>
    %5 = tpu.matmul %2, %0, %cst {dimension_numbers = #tpu.dot_dimension_numbers<[1], [1], [0], [0], [0, 0, 1, 0], [], []>} : vector<64x3xf32>, vector<256x3xf32>, vector<64x256xf32> -> vector<64x256xf32>
    %6 = vector.broadcast %4 : vector<64x1xf32> to vector<64x256xf32>
    %7 = arith.addf %5, %6 : vector<64x256xf32>
    %cst_4 = arith.constant 0.000000e+00 : f32
    %8 = vector.broadcast %cst_4 : f32 to vector<64x256xf32>
    %9 = arith.maximumf %7, %8 : vector<64x256xf32>
    %c64 = arith.constant 64 : index
    %c0_5 = arith.constant 0 : index
    %10 = vector.load %arg2[%c64, %c0_5] : memref<288x64xbf16, #tpu.memory_space<vmem>>, vector<32x64xbf16>
    %c208 = arith.constant 208 : index
    %c0_6 = arith.constant 0 : index
    %11 = vector.load %arg2[%c208, %c0_6] : memref<288x64xbf16, #tpu.memory_space<vmem>>, vector<32x1xbf16>
    %12 = arith.extf %11 : vector<32x1xbf16> to vector<32x1xf32>
    %13 = arith.truncf %9 : vector<64x256xf32> to vector<64x256xbf16>
    %cst_7 = arith.constant dense<0.000000e+00> : vector<32x256xf32>
    %14 = tpu.matmul %10, %13, %cst_7 {dimension_numbers = #tpu.dot_dimension_numbers<[1], [0], [0], [1], [0, 0, 1, 1], [], []>} : vector<32x64xbf16>, vector<64x256xbf16>, vector<32x256xf32> -> vector<32x256xf32>
    %15 = vector.broadcast %12 : vector<32x1xf32> to vector<32x256xf32>
    %16 = arith.addf %14, %15 : vector<32x256xf32>
    %cst_8 = arith.constant 0.000000e+00 : f32
    %17 = vector.broadcast %cst_8 : f32 to vector<32x256xf32>
    %18 = arith.maximumf %16, %17 : vector<32x256xf32>
    %c96 = arith.constant 96 : index
    %c0_9 = arith.constant 0 : index
    %19 = vector.load %arg2[%c96, %c0_9] : memref<288x64xbf16, #tpu.memory_space<vmem>>, vector<16x32xbf16>
    %c240 = arith.constant 240 : index
    %c0_10 = arith.constant 0 : index
    %20 = vector.load %arg2[%c240, %c0_10] : memref<288x64xbf16, #tpu.memory_space<vmem>>, vector<16x1xbf16>
    %21 = arith.extf %20 : vector<16x1xbf16> to vector<16x1xf32>
    %22 = arith.truncf %18 : vector<32x256xf32> to vector<32x256xbf16>
    %cst_11 = arith.constant dense<0.000000e+00> : vector<16x256xf32>
    %23 = tpu.matmul %19, %22, %cst_11 {dimension_numbers = #tpu.dot_dimension_numbers<[1], [0], [0], [1], [0, 0, 1, 1], [], []>} : vector<16x32xbf16>, vector<32x256xbf16>, vector<16x256xf32> -> vector<16x256xf32>
    %24 = vector.broadcast %21 : vector<16x1xf32> to vector<16x256xf32>
    %25 = arith.addf %23, %24 : vector<16x256xf32>
    %cst_12 = arith.constant 0.000000e+00 : f32
    %26 = vector.broadcast %cst_12 : f32 to vector<16x256xf32>
    %27 = arith.maximumf %25, %26 : vector<16x256xf32>
    %c112 = arith.constant 112 : index
    %c0_13 = arith.constant 0 : index
    %28 = vector.load %arg2[%c112, %c0_13] : memref<288x64xbf16, #tpu.memory_space<vmem>>, vector<8x16xbf16>
    %c256 = arith.constant 256 : index
    %c0_14 = arith.constant 0 : index
    %29 = vector.load %arg2[%c256, %c0_14] : memref<288x64xbf16, #tpu.memory_space<vmem>>, vector<8x1xbf16>
    %30 = arith.extf %29 : vector<8x1xbf16> to vector<8x1xf32>
    %31 = arith.truncf %27 : vector<16x256xf32> to vector<16x256xbf16>
    %cst_15 = arith.constant dense<0.000000e+00> : vector<8x256xf32>
    %32 = tpu.matmul %28, %31, %cst_15 {dimension_numbers = #tpu.dot_dimension_numbers<[1], [0], [0], [1], [0, 0, 1, 1], [], []>} : vector<8x16xbf16>, vector<16x256xbf16>, vector<8x256xf32> -> vector<8x256xf32>
    %33 = vector.broadcast %30 : vector<8x1xf32> to vector<8x256xf32>
    %34 = arith.addf %32, %33 : vector<8x256xf32>
    %cst_16 = arith.constant 0.000000e+00 : f32
    %35 = vector.broadcast %cst_16 : f32 to vector<8x256xf32>
    %36 = arith.maximumf %34, %35 : vector<8x256xf32>
    %37 = tpu.transpose %36, [1, 0] : vector<8x256xf32> -> vector<256x8xf32>
    %c128 = arith.constant 128 : index
    %c0_17 = arith.constant 0 : index
    %38 = vector.load %arg2[%c128, %c0_17] : memref<288x64xbf16, #tpu.memory_space<vmem>>, vector<8x6xbf16>
    %39 = arith.extf %38 : vector<8x6xbf16> to vector<8x6xf32>
    %c272 = arith.constant 272 : index
    %c0_18 = arith.constant 0 : index
    %40 = vector.load %arg2[%c272, %c0_18] : memref<288x64xbf16, #tpu.memory_space<vmem>>, vector<1x6xbf16>
    %41 = arith.extf %40 : vector<1x6xbf16> to vector<1x6xf32>
    %cst_19 = arith.constant dense<0.000000e+00> : vector<256x6xf32>
    %42 = tpu.matmul %37, %39, %cst_19 {dimension_numbers = #tpu.dot_dimension_numbers<[1], [0], [0], [1], [0, 0, 1, 1], [], []>} : vector<256x8xf32>, vector<8x6xf32>, vector<256x6xf32> -> vector<256x6xf32>
    %43 = vector.broadcast %41 : vector<1x6xf32> to vector<256x6xf32>
    %44 = arith.addf %42, %43 : vector<256x6xf32>
    %c0_20 = arith.constant 0 : index
    %c0_21 = arith.constant 0 : index
    %45 = vector.load %arg3[%c0_20, %c0_21] : memref<256x6xf32, #tpu.memory_space<vmem>>, vector<256x6xf32>
    tpu.vector_store %arg3[%c0_20, %c0_21], %44 {strides = array<i32>} : memref<256x6xf32, #tpu.memory_space<vmem>>, vector<256x6xf32>,
    return
  }
  func.func @transform_0(%arg0: i32) -> (i32, i32) {
    %c0_i32 = arith.constant 0 : i32
    %c0_i32_0 = arith.constant 0 : i32
    return %arg0, %c0_i32 : i32, i32
  }
  func.func @transform_1(%arg0: i32) -> (i32, i32) {
    %c0_i32 = arith.constant 0 : i32
    %c0_i32_0 = arith.constant 0 : i32
    %c0_i32_1 = arith.constant 0 : i32
    return %c0_i32, %c0_i32_0 : i32, i32
  }
  func.func @transform_2(%arg0: i32) -> (i32, i32) {
    %c0_i32 = arith.constant 0 : i32
    %c0_i32_0 = arith.constant 0 : i32
    return %arg0, %c0_i32 : i32, i32
  }
}

</mosaic_0001>

<bundles_post_ra>
// kernel: mlp_forward.1
= control target key start
LH: loop header
LB: loop body
LE: loop exit
PB: predicated region body
PF: predicated region fallthrough
CT: control target
= control target key end

     0   :  { %vm116_vm0 = vcmask 23552   ;;  %v1189_v21 = vmov 0   ;;  %vm385_vm1 = vcmask 523264   ;;  %vm463_vm2 = vcmask 261120   ;;  %s1565_s0 = inlined_call_operand.vmem [shape: f32[200,3], index: 0, kind: input, shape index: {}]   ;;  %s1566_s1 = inlined_call_operand.vmem [shape: bf16[288,64], index: 1, kind: input, shape index: {}]   ;;  %s1567_s2 = inlined_call_operand.vmem [shape: f32[200,6], index: 2, kind: output, shape index: {}]  }
   0x1   :  { %v27_v0 = vld [vmem:[%s1565_s0 + $0x78] sm:$0xff]  ;;  %v26_v2 = vld [vmem:[%s1565_s0 + $0x70] sm:$0xff]  ;;  %v25_v4 = vld [vmem:[%s1565_s0 + $0x68] sm:$0xff]  ;;  %1162 = vset.pattern.permute.xlu1 %v1189_v21  ;;  %1151 = vset.pattern.permute.xlu0 %v1189_v21  ;;  %vm509_vm3 = vcmask 130048   ;;  %vm610_vm4 = vcmask 64512   ;;  %vm820_vm5 = vcmask 48128  }
   0x2   :  { %v43_v1 = vld [vmem:[%s1565_s0 + $0xf8] sm:$0xff]  ;;  %990 = vmatpush.xpose.msk.msra.mxu0 %vm116_vm0, %v27_v0  ;;  %v42_v3 = vld [vmem:[%s1565_s0 + $0xf0] sm:$0xff]  ;;  %v41_v5 = vld [vmem:[%s1565_s0 + $0xe8] sm:$0xff]  ;;  %1173 = vset.pattern.permute.xlu2 %v1189_v21 }
   0x3   :  { %1014 = vmatpush.xpose.msk.msra.mxu1 %vm116_vm0, %v43_v1  ;;  %v24_v6 = vld [vmem:[%s1565_s0 + $0x60] sm:$0xff]  ;;  %v23_v8 = vld [vmem:[%s1565_s0 + $0x58] sm:$0xff]  ;;  %v22_v10 = vld [vmem:[%s1565_s0 + $0x50] sm:$0xff] }
   0x4   :  { %v40_v7 = vld [vmem:[%s1565_s0 + $0xe0] sm:$0xff]  ;;  %v39_v9 = vld [vmem:[%s1565_s0 + $0xd8] sm:$0xff]  ;;  %v38_v11 = vld [vmem:[%s1565_s0 + $0xd0] sm:$0xff] }
   0x5   :  { %v21_v12 = vld [vmem:[%s1565_s0 + $0x48] sm:$0xff]  ;;  %v20_v14 = vld [vmem:[%s1565_s0 + $0x40] sm:$0xff]  ;;  %v1141_v16 = vld [vmem:[%s1566_s1 + $0x50] sm:$0xff]  }
   0x6   :  { %991 = vmatpush.xpose.msk.msra.mxu0 %vm116_vm0, %v26_v2  ;;  %v37_v13 = vld [vmem:[%s1565_s0 + $0xc8] sm:$0xff]  ;;  %v36_v15 = vld [vmem:[%s1565_s0 + $0xc0] sm:$0xff]  ;;  %v1115_v17 = vunpack.c.l.bf16 %v1141_v16  ;;  %v1116_v18 = vunpack.c.h.bf16 %v1141_v16  ;;  %v19_v19 = vld [vmem:[%s1565_s0 + $0x38] sm:$0xff] }
   0x7   :  { %1015 = vmatpush.xpose.msk.msra.mxu1 %vm116_vm0, %v42_v3  ;;  %v35_v20 = vld [vmem:[%s1565_s0 + $0xb8] sm:$0xff]  ;;  %v18_v23 = vld [vmem:[%s1565_s0 + $0x30] sm:$0xff]  ;;  %v1140_v25 = vld [vmem:[%s1566_s1 + $0x48] sm:$0xff]  }
   0x8   :  { %v1163_v22 = vpack.i.bf16 %v1116_v18, %v1115_v17  ;;  %v34_v24 = vld [vmem:[%s1565_s0 + $0xb0] sm:$0xff]  ;;  %v1111_v26 = vunpack.c.l.bf16 %v1140_v25  ;;  %v1112_v27 = vunpack.c.h.bf16 %v1140_v25  ;;  %v17_v28 = vld [vmem:[%s1565_s0 + $0x28] sm:$0xff]  ;;  %v16_v31 = vld [vmem:[%s1565_s0 + $0x20] sm:$0xff] }
   0x9   :  { %v33_v29 = vld [vmem:[%s1565_s0 + $0xa8] sm:$0xff]  ;;  %v32_v32 = vld [vmem:[%s1565_s0 + $0xa0] sm:$0xff]  ;;  %v15_v33 = vld [vmem:[%s1565_s0 + $0x18] sm:$0xff] }
   0xa   :  { %992 = vmatpush.xpose.msk.msra.mxu0 %vm116_vm0, %v25_v4  ;;  %1164 = vperm.xlu1 %1162, %v1163_v22   ;;  %v1168_v30 = vpack.i.bf16 %v1112_v27, %v1111_v26  ;;  %v31_v34 = vld [vmem:[%s1565_s0 + $0x98] sm:$0xff]  ;;  %v14_v35 = vld [vmem:[%s1565_s0 + $0x10] sm:$0xff]  ;;  %v13_v37 = vld [vmem:[%s1565_s0 + $0x8] sm:$0xff] }
   0xb   :  { %1016 = vmatpush.xpose.msk.msra.mxu1 %vm116_vm0, %v41_v5  ;;  %v30_v36 = vld [vmem:[%s1565_s0 + $0x90] sm:$0xff]  ;;  %v29_v38 = vld [vmem:[%s1565_s0 + $0x88] sm:$0xff]  ;;  %v1094_v39 = vld [vmem:[%s1566_s1] sm:$0xff]  }
   0xc   :  { %v12_v40 = vld [vmem:[%s1565_s0] sm:$0xff]  ;;  %v1095_v42 = vunpack.c.l.bf16 %v1094_v39  ;;  %v1096_v47 = vunpack.c.h.bf16 %v1094_v39  ;;  %v1142_v48 = vld [vmem:[%s1566_s1 + $0x58] sm:$0xff]   ;;  %v1137_v52 = vld [vmem:[%s1566_s1 + $0x8] sm:$0xff]  }
   0xd   :  { %v28_v41 = vld [vmem:[%s1565_s0 + $0x80] sm:$0xff]  ;;  %v1119_v49 = vunpack.c.l.bf16 %v1142_v48  ;;  %v1120_v50 = vunpack.c.h.bf16 %v1142_v48  ;;  %v1099_v53 = vunpack.c.l.bf16 %v1137_v52  ;;  %v1100_v54 = vunpack.c.h.bf16 %v1137_v52  ;;  %v1146_v55 = vld [vmem:[%s1566_s1 + $0x78] sm:$0xff]   ;;  %v1138_v57 = vld [vmem:[%s1566_s1 + $0x10] sm:$0xff]  }
   0xe   :  { %993 = vmatpush.xpose.msk.msra.mxu0 %vm116_vm0, %v24_v6  ;;  %v1143_v43 = vld [vmem:[%s1566_s1 + $0x60] sm:$0xff]   ;;  %v1135_v58 = vunpack.c.l.bf16 %v1146_v55  ;;  %v1136_v59 = vunpack.c.h.bf16 %v1146_v55  ;;  %v1103_v62 = vunpack.c.l.bf16 %v1138_v57  ;;  %v1104_v63 = vunpack.c.h.bf16 %v1138_v57  ;;  %v1139_v0 = vld [vmem:[%s1566_s1 + $0x18] sm:$0xff]   ;;  %v1145_v52 = vld [vmem:[%s1566_s1 + $0x70] sm:$0xff]  }
   0xf   :  { %1017 = vmatpush.xpose.msk.msra.mxu1 %vm116_vm0, %v40_v7  ;;  %v1123_v44 = vunpack.c.l.bf16 %v1143_v43  ;;  %v1124_v45 = vunpack.c.h.bf16 %v1143_v43  ;;  %v1157_v51 = vpack.i.bf16 %v1120_v50, %v1119_v49  ;;  %v500_v56 = vld [vmem:[%s1566_s1 + $0x80] sm:$0xf]  ;;  %v1107_v1 = vunpack.c.l.bf16 %v1139_v0 }
  0x10   :  { %v501_v60 = vunpack.c.l.bf16 %v500_v56  ;;  %v1184_v61 = vpack.i.bf16 %v1136_v59, %v1135_v58  ;;  %v1108_v2 = vunpack.c.h.bf16 %v1139_v0  ;;  %v1131_v55 = vunpack.c.l.bf16 %v1145_v52 }
  0x11   :  { %v1152_v46 = vpack.i.bf16 %v1124_v45, %v1123_v44  ;;  %v1132_v56 = vunpack.c.h.bf16 %v1145_v52 }
  0x12   :  { %994 = vmatpush.xpose.msk.msra.mxu0 %vm116_vm0, %v23_v8  ;;  %1169 = vperm.xlu1 %1162, %v1168_v30  }
  0x13   :  { %1018 = vmatpush.xpose.msk.msra.mxu1 %vm116_vm0, %v39_v9  ;;  %1153 = vperm.xlu0 %1151, %v1152_v46   ;;  %v1174_v0 = vpack.i.bf16 %v1132_v56, %v1131_v55 }
  0x15   :  { %1175 = vperm.xlu2 %1173, %v1174_v0  }
  0x16   :  { %995 = vmatpush.xpose.msk.msra.mxu0 %vm116_vm0, %v22_v10 }
  0x17   :  { %1019 = vmatpush.xpose.msk.msra.mxu1 %vm116_vm0, %v38_v11 }
  0x1a   :  { %996 = vmatpush.xpose.msk.msra.mxu0 %vm116_vm0, %v21_v12  ;;  %506 = vperm.xlu1 %1162, %v501_v60  }
  0x1b   :  { %1020 = vmatpush.xpose.msk.msra.mxu1 %vm116_vm0, %v37_v13  ;;  %1158 = vperm.xlu0 %1151, %v1157_v51  }
  0x1e   :  { %997 = vmatpush.xpose.msk.msra.mxu0 %vm116_vm0, %v20_v14 }
  0x1f   :  { %1021 = vmatpush.xpose.msk.msra.mxu1 %vm116_vm0, %v36_v15 }
  0x22   :  { %998 = vmatpush.xpose.msk.msra.mxu0 %vm116_vm0, %v19_v19 }
  0x23   :  { %1022 = vmatpush.xpose.msk.msra.mxu1 %vm116_vm0, %v35_v20  ;;  %1185 = vperm.xlu0 %1151, %v1184_v61  }
  0x26   :  { %999 = vmatpush.xpose.msk.msra.mxu0 %vm116_vm0, %v18_v23 }
  0x27   :  { %1023 = vmatpush.xpose.msk.msra.mxu1 %vm116_vm0, %v34_v24 }
  0x2a   :  { %1000 = vmatpush.xpose.msk.msra.mxu0 %vm116_vm0, %v17_v28 }
  0x2b   :  { %1024 = vmatpush.xpose.msk.msra.mxu1 %vm116_vm0, %v33_v29 }
  0x2e   :  { %1001 = vmatpush.xpose.msk.msra.mxu0 %vm116_vm0, %v16_v31 }
  0x2f   :  { %1025 = vmatpush.xpose.msk.msra.mxu1 %vm116_vm0, %v32_v32 }
  0x32   :  { %1002 = vmatpush.xpose.msk.msra.mxu0 %vm116_vm0, %v15_v33 }
  0x33   :  { %1026 = vmatpush.xpose.msk.msra.mxu1 %vm116_vm0, %v31_v34 }
  0x36   :  { %1003 = vmatpush.xpose.msk.msra.mxu0 %vm116_vm0, %v14_v35 }
  0x37   :  { %1027 = vmatpush.xpose.msk.msra.mxu1 %vm116_vm0, %v30_v36 }
  0x3a   :  { %1004 = vmatpush.xpose.msk.msra.mxu0 %vm116_vm0, %v13_v37 }
  0x3b   :  { %1028 = vmatpush.xpose.msk.msra.mxu1 %vm116_vm0, %v29_v38 }
  0x3e   :  { %1005 = vmatpush.xpose.msk.msra.mxu0 %vm116_vm0, %v12_v40 }
  0x3f   :  { %1029 = vmatpush.xpose.msk.msra.mxu1 %vm116_vm0, %v28_v41 }
  0x41   :  { %1006 = vmatmul.msk.f32.vlgmr.msra.gmra.mxu0 %vm116_vm0, %v1095_v42 }
  0x42   :  { %1030 = vmatmul.msk.f32.vlgmr.msra.gmra.mxu1 %vm116_vm0, %v1095_v42 }
  0x49   :  { %1007 = vmatmul.msk.f32.gmra.mxu0 %vm116_vm0, %v1096_v47 }
  0x4a   :  { %1031 = vmatmul.msk.f32.gmra.mxu1 %vm116_vm0, %v1096_v47 }
  0x51   :  { %1008 = vmatmul.msk.f32.gmra.mxu0 %vm116_vm0, %v1099_v53 }
  0x52   :  { %1032 = vmatmul.msk.f32.gmra.mxu1 %vm116_vm0, %v1099_v53 }
  0x59   :  { %1009 = vmatmul.msk.f32.gmra.mxu0 %vm116_vm0, %v1100_v54 }
  0x5a   :  { %1033 = vmatmul.msk.f32.gmra.mxu1 %vm116_vm0, %v1100_v54 }
  0x61   :  { %1010 = vmatmul.msk.f32.gmra.mxu0 %vm116_vm0, %v1103_v62 }
  0x62   :  { %1034 = vmatmul.msk.f32.gmra.mxu1 %vm116_vm0, %v1103_v62 }
  0x69   :  { %1011 = vmatmul.msk.f32.gmra.mxu0 %vm116_vm0, %v1104_v63 }
  0x6a   :  { %1035 = vmatmul.msk.f32.gmra.mxu1 %vm116_vm0, %v1104_v63 }
  0x71   :  { %1012 = vmatmul.msk.f32.gmra.mxu0 %vm116_vm0, %v1107_v1 }
  0x72   :  { %1036 = vmatmul.msk.f32.gmra.mxu1 %vm116_vm0, %v1107_v1  ;;  %v1144_v1 = vld [vmem:[%s1566_s1 + $0x68] sm:$0xff]  }
  0x79   :  { %1013 = vmatmul.msk.f32.gmra.mxu0 %vm116_vm0, %v1108_v2 }
  0x7a   :  { %1037 = vmatmul.msk.f32.gmra.mxu1 %vm116_vm0, %v1108_v2 }
  0x7c   :  { %v1165_v16 = vpop.permute.xlu1 %1164 }
  0x7d   :  { %v1167_v27 = vunpack.i.h.bf16 %v1165_v16  ;;  %v1166_v35 = vunpack.i.l.bf16 %v1165_v16  ;;  %v1091_v16 = vld [vmem:[%s1566_s1 + $0x28] sm:$0xff] }
  0x84   :  { %v1170_v23 = vpop.permute.xlu1 %1169 }
  0x85   :  { %v1154_v15 = vpop.permute.xlu0 %1153  ;;  %v1172_v36 = vunpack.i.h.bf16 %v1170_v23  ;;  %v1171_v37 = vunpack.i.l.bf16 %v1170_v23 }
  0x86   :  { %v1155_v19 = vunpack.i.l.bf16 %v1154_v15  ;;  %v1156_v24 = vunpack.i.h.bf16 %v1154_v15 }
  0x8d   :  { %v1159_v20 = vpop.permute.xlu0 %1158 }
  0x8e   :  { %v1161_v21 = vunpack.i.h.bf16 %v1159_v20  ;;  %v1160_v22 = vunpack.i.l.bf16 %v1159_v20  ;;  %v1176_v20 = vpop.permute.xlu2 %1175 }
  0x8f   :  { %v1177_v23 = vunpack.i.l.bf16 %v1176_v20 }
  0xbe   :  { %v1379_v3 = vpop.f32.mrf.mxu0 }
  0xbf   :  { %v295_v4 = vpop.f32.mrf.mxu1  ;;  %v255_v2 = vadd.f32 %v1171_v37, %v1379_v3  ;;  %v1090_v3 = vld [vmem:[%s1566_s1 + $0x20] sm:$0xff] }
  0xc0   :  { %v296_v51 = vadd.f32 %v1171_v37, %v295_v4 }
  0xc6   :  { %v257_v5 = vpop.f32.mrf.mxu0 }
  0xc7   :  { %v298_v6 = vpop.f32.mrf.mxu1  ;;  %v258_v57 = vadd.f32 %v1172_v36, %v257_v5  ;;  %v1128_v5 = vunpack.c.h.bf16 %v1144_v1 }
  0xc8   :  { %v299_v58 = vadd.f32 %v1172_v36, %v298_v6 }
  0xc9   :  { %v321_v6 = vmax.f32 %v258_v57, 0.0 }
  0xce   :  { %v260_v7 = vpop.f32.mrf.mxu0 }
  0xcf   :  { %v301_v8 = vpop.f32.mrf.mxu1  ;;  %v261_v53 = vadd.f32 %v1166_v35, %v260_v7  ;;  %v320_v7 = vmax.f32 %v296_v51, 0.0 }
  0xd0   :  { %v302_v43 = vadd.f32 %v1166_v35, %v301_v8  ;;  %v1127_v8 = vunpack.c.l.bf16 %v1144_v1 }
  0xd1   :  { %v323_v4 = vmax.f32 %v261_v53, 0.0  ;;  %v1186_v53 = vpop.permute.xlu0 %1185 }
  0xd2   :  { %v324_v59 = vmax.f32 %v302_v43, 0.0  ;;  %v1188_v56 = vunpack.i.h.bf16 %v1186_v53 }
  0xd6   :  { %v263_v9 = vpop.f32.mrf.mxu0 }
  0xd7   :  { %v304_v10 = vpop.f32.mrf.mxu1  ;;  %v264_v44 = vadd.f32 %v1167_v27, %v263_v9  ;;  %v322_v9 = vmax.f32 %v299_v58, 0.0 }
  0xd8   :  { %v305_v45 = vadd.f32 %v1167_v27, %v304_v10 }
  0xd9   :  { %v325_v60 = vmax.f32 %v264_v44, 0.0  ;;  %v348_v15 = vpack.c.bf16 %v322_v9, %v320_v7  ;;  %v507_v9 = vpop.permute.xlu1 %506 }
  0xda   :  { %v326_v61 = vmax.f32 %v305_v45, 0.0 }
  0xdb   :  { %v349_v10 = vpack.c.bf16 %v325_v60, %v323_v4 }
  0xde   :  { %v266_v11 = vpop.f32.mrf.mxu0 }
  0xdf   :  { %v307_v12 = vpop.f32.mrf.mxu1  ;;  %v267_v38 = vadd.f32 %v1160_v22, %v266_v11  ;;  %v350_v11 = vpack.c.bf16 %v326_v61, %v324_v59 }
  0xe0   :  { %v308_v28 = vadd.f32 %v1160_v22, %v307_v12  ;;  %v319_v12 = vmax.f32 %v255_v2, 0.0  ;;  %v499_v2 = vld [vmem:[%s1566_s1 + $0x38] sm:$0xf] }
  0xe1   :  { %v327_v54 = vmax.f32 %v267_v38, 0.0 }
  0xe2   :  { %v328_v46 = vmax.f32 %v308_v28, 0.0 }
  0xe6   :  { %v269_v13 = vpop.f32.mrf.mxu0 }
  0xe7   :  { %v310_v14 = vpop.f32.mrf.mxu1  ;;  %v270_v31 = vadd.f32 %v1161_v21, %v269_v13  ;;  %v1179_v13 = vpack.i.bf16 %v1128_v5, %v1127_v8  ;;  %v605_v5 = vld [vmem:[%s1566_s1 + $0x40] sm:$0xf] }
  0xe8   :  { %v311_v32 = vadd.f32 %v1161_v21, %v310_v14  ;;  %v347_v14 = vpack.c.bf16 %v321_v6, %v319_v12  ;;  %v606_v6 = vunpack.c.l.bf16 %v605_v5 }
  0xe9   :  { %v329_v47 = vmax.f32 %v270_v31, 0.0  ;;  %1180 = vperm.xlu2 %1173, %v1179_v13  }
  0xea   :  { %v330_v48 = vmax.f32 %v311_v32, 0.0  ;;  %722 = vmatpush.msrb.mxu1 %v606_v6 }
  0xeb   :  { %v351_v62 = vpack.c.bf16 %v329_v47, %v327_v54  ;;  %v1092_v47 = vld [vmem:[%s1566_s1 + $0x30] sm:$0xff]  ;;  %v1187_v54 = vunpack.i.l.bf16 %v1186_v53 }
  0xec   :  { %v352_v63 = vpack.c.bf16 %v330_v48, %v328_v46 }
  0xee   :  { %v272_v17 = vpop.f32.mrf.mxu0 }
  0xef   :  { %v313_v18 = vpop.f32.mrf.mxu1  ;;  %v273_v25 = vadd.f32 %v1155_v19, %v272_v17 }
  0xf0   :  { %v314_v26 = vadd.f32 %v1155_v19, %v313_v18 }
  0xf1   :  { %v331_v39 = vmax.f32 %v273_v25, 0.0  ;;  %v1178_v25 = vunpack.i.h.bf16 %v1176_v20 }
  0xf2   :  { %v332_v40 = vmax.f32 %v314_v26, 0.0 }
  0xf6   :  { %v275_v29 = vpop.f32.mrf.mxu0 }
  0xf7   :  { %v316_v30 = vpop.f32.mrf.mxu1  ;;  %v276_v33 = vadd.f32 %v1156_v24, %v275_v29 }
  0xf8   :  { %v317_v34 = vadd.f32 %v1156_v24, %v316_v30 }
  0xf9   :  { %v333_v41 = vmax.f32 %v276_v33, 0.0 }
  0xfa   :  { %v334_v42 = vmax.f32 %v317_v34, 0.0 }
  0xfb   :  { %v353_v49 = vpack.c.bf16 %v333_v41, %v331_v39 }
  0xfc   :  { %v354_v50 = vpack.c.bf16 %v334_v42, %v332_v40 }
  0xfd   :  { %396 = vmatpush.bf16.msra.mxu2 %v353_v49 }
  0xfe   :  { %415 = vmatpush.bf16.msrb.mxu0 %v354_v50 }
 0x101   :  { %397 = vmatpush.bf16.msra.mxu2 %v351_v62 }
 0x102   :  { %416 = vmatpush.bf16.msrb.mxu0 %v352_v63 }
 0x105   :  { %398 = vmatpush.bf16.msra.mxu2 %v349_v10 }
 0x106   :  { %417 = vmatpush.bf16.msrb.mxu0 %v350_v11 }
 0x109   :  { %399 = vmatpush.bf16.msra.mxu2 %v347_v14 }
 0x10a   :  { %418 = vmatpush.bf16.msrb.mxu0 %v348_v15 }
 0x10c   :  { %1046 = vmatmul.msk.bf16.vlgmr.msra.gmra.mxu2 %vm385_vm1, %v1090_v3 }
 0x10d   :  { %1048 = vmatmul.msk.bf16.vlgmr.msrb.gmra.mxu0 %vm385_vm1, %v1090_v3 }
 0x11c   :  { %1047 = vmatmul.msk.bf16.gmra.mxu2 %vm385_vm1, %v1091_v16 }
 0x11d   :  { %1049 = vmatmul.msk.bf16.gmra.mxu0 %vm385_vm1, %v1091_v16 }
 0x143   :  { %v1181_v24 = vpop.permute.xlu2 %1180 }
 0x144   :  { %v1183_v28 = vunpack.i.h.bf16 %v1181_v24  ;;  %v1182_v29 = vunpack.i.l.bf16 %v1181_v24 }
 0x18a   :  { %v420_v17 = vpop.f32.mrf.mxu0 }
 0x18b   :  { %v421_v31 = vadd.f32 %v1182_v29, %v420_v17 }
 0x18d   :  { %v431_v39 = vmax.f32 %v421_v31, 0.0 }
 0x18f   :  { %v401_v18 = vpop.f32.mrf.mxu2 }
 0x190   :  { %v402_v43 = vadd.f32 %v1182_v29, %v401_v18 }
 0x192   :  { %v422_v19 = vpop.f32.mrf.mxu0  ;;  %v430_v50 = vmax.f32 %v402_v43, 0.0 }
 0x193   :  { %v423_v32 = vadd.f32 %v1183_v28, %v422_v19 }
 0x195   :  { %v433_v36 = vmax.f32 %v423_v32, 0.0 }
 0x197   :  { %v403_v21 = vpop.f32.mrf.mxu2  ;;  %v445_v46 = vpack.c.bf16 %v433_v36, %v431_v39 }
 0x198   :  { %v404_v41 = vadd.f32 %v1183_v28, %v403_v21 }
 0x19a   :  { %v425_v22 = vpop.f32.mrf.mxu0  ;;  %v432_v48 = vmax.f32 %v404_v41, 0.0 }
 0x19b   :  { %v426_v26 = vadd.f32 %v1177_v23, %v425_v22 }
 0x19c   :  { %v444_v51 = vpack.c.bf16 %v432_v48, %v430_v50 }
 0x19d   :  { %v435_v33 = vmax.f32 %v426_v26, 0.0 }
 0x19f   :  { %v406_v27 = vpop.f32.mrf.mxu2 }
 0x1a0   :  { %v407_v37 = vadd.f32 %v1177_v23, %v406_v27 }
 0x1a2   :  { %v427_v30 = vpop.f32.mrf.mxu0  ;;  %v434_v44 = vmax.f32 %v407_v37, 0.0 }
 0x1a3   :  { %v428_v34 = vadd.f32 %v1178_v25, %v427_v30 }
 0x1a5   :  { %v437_v35 = vmax.f32 %v428_v34, 0.0 }
 0x1a7   :  { %v447_v38 = vpack.c.bf16 %v437_v35, %v435_v33  ;;  %v408_v40 = vpop.f32.mrf.mxu2 }
 0x1a8   :  { %v409_v42 = vadd.f32 %v1178_v25, %v408_v40 }
 0x1a9   :  { %487 = vmatpush.bf16.msra.mxu3 %v447_v38 }
 0x1aa   :  { %v436_v45 = vmax.f32 %v409_v42, 0.0 }
 0x1ac   :  { %v446_v49 = vpack.c.bf16 %v436_v45, %v434_v44 }
 0x1ad   :  { %488 = vmatpush.bf16.msra.mxu3 %v445_v46 }
 0x1ae   :  { %473 = vmatpush.bf16.msrb.mxu2 %v446_v49 }
 0x1b0   :  { %1055 = vmatmul.msk.bf16.vlgmr.msra.gmra.mxu3 %vm463_vm2, %v1092_v47 }
 0x1b2   :  { %474 = vmatpush.bf16.msrb.mxu2 %v444_v51 }
 0x1b5   :  { %1054 = vmatmul.msk.bf16.vlgmr.msrb.gmra.mxu2 %vm463_vm2, %v1092_v47  ;;  %v607_v47 = vld [vmem:[%s1566_s1 + $0x88] sm:$0x1] }
 0x1b6   :  { %v608_v48 = vunpack.c.l.bf16 %v607_v47 }
 0x1b8   :  { %v1437_v50 = vperm.slane %v608_v48, 0 }
 0x233   :  { %v490_v52 = vpop.f32.mrf.mxu3 }
 0x234   :  { %v491_v57 = vadd.f32 %v1187_v54, %v490_v52 }
 0x236   :  { %v496_v60 = vmax.f32 %v491_v57, 0.0 }
 0x238   :  { %v476_v55 = vpop.f32.mrf.mxu2 }
 0x239   :  { %v477_v62 = vadd.f32 %v1187_v54, %v476_v55 }
 0x23b   :  { %v492_v58 = vpop.f32.mrf.mxu3  ;;  %v495_v4 = vmax.f32 %v477_v62, 0.0 }
 0x23c   :  { %v493_v59 = vadd.f32 %v1188_v56, %v492_v58 }
 0x23e   :  { %v498_v61 = vmax.f32 %v493_v59, 0.0 }
 0x240   :  { %v503_v63 = vpack.c.bf16 %v498_v61, %v496_v60  ;;  %v478_v0 = vpop.f32.mrf.mxu2 }
 0x241   :  { %v479_v1 = vadd.f32 %v1188_v56, %v478_v0 }
 0x242   :  { %533 = vmatpush.bf16.msrb.mxu3 %v503_v63 }
 0x243   :  { %v497_v7 = vmax.f32 %v479_v1, 0.0 }
 0x245   :  { %1057 = vmatmul.msk.bf16.vlgmr.msrb.gmra.mxu3 %vm509_vm3, %v499_v2  ;;  %v502_v8 = vpack.c.bf16 %v497_v7, %v495_v4 }
 0x246   :  { %1148 = vmatpush.msra.mxu3 %v606_v6 }
 0x247   :  { %520 = vmatpush.bf16.msra.mxu2 %v502_v8 }
 0x24a   :  { %1056 = vmatmul.msk.bf16.vlgmr.msra.gmra.mxu2 %vm509_vm3, %v499_v2 }
 0x24b   :  { %1147 = vmatpush.msrb.mxu2 %v606_v6 }
 0x2c8   :  { %v535_v10 = vpop.f32.mrf.mxu3 }
 0x2c9   :  { %v536_v11 = vadd.f32 %v535_v10, %v507_v9 }
 0x2cb   :  { %v540_v12 = vmax.f32 %v536_v11, 0.0 }
 0x2cd   :  { %573 = vxpose.xlu2.b32.start.end [1/1] (short) %v540_v12, 128  ;;  %v522_v13 = vpop.f32.mrf.mxu2 }
 0x2ce   :  { %v523_v14 = vadd.f32 %v522_v13, %v507_v9 }
 0x2d0   :  { %v537_v15 = vpop.f32.mrf.mxu3  ;;  %v539_v3 = vmax.f32 %v523_v14, 0.0 }
 0x2d2   :  { %541 = vxpose.xlu0.b32.start.end [1/1] (short) %v539_v3, 128 }
 0x2d5   :  { %v524_v16 = vpop.f32.mrf.mxu2 }
 0x366   :  { %v589_v17 = vpop.trf.xlu2 }
 0x367   :  { %1074 = vmatmul.msk.f32.vlgmr.msra.gmra.mxu3 %vm610_vm4, %v589_v17 }
 0x36e   :  { %v590_v18 = vpop.trf.xlu2 }
 0x36f   :  { %1075 = vmatmul.msk.f32.gmra.mxu3 %vm610_vm4, %v590_v18 }
 0x376   :  { %v591_v19 = vpop.trf.xlu2  ;;  %v557_v20 = vpop.trf.xlu0 }
 0x377   :  { %1076 = vmatmul.msk.f32.gmra.mxu3 %vm610_vm4, %v591_v19  ;;  %1058 = vmatmul.msk.f32.vlgmr.msrb.gmra.mxu1 %vm610_vm4, %v557_v20 }
 0x37e   :  { %v592_v21 = vpop.trf.xlu2  ;;  %v558_v22 = vpop.trf.xlu0 }
 0x37f   :  { %1077 = vmatmul.msk.f32.gmra.mxu3 %vm610_vm4, %v592_v21  ;;  %1059 = vmatmul.msk.f32.gmra.mxu1 %vm610_vm4, %v558_v22 }
 0x386   :  { %v593_v23 = vpop.trf.xlu2  ;;  %v559_v24 = vpop.trf.xlu0 }
 0x387   :  { %1078 = vmatmul.msk.f32.gmra.mxu3 %vm610_vm4, %v593_v23  ;;  %1060 = vmatmul.msk.f32.gmra.mxu1 %vm610_vm4, %v559_v24 }
 0x38e   :  { %v594_v25 = vpop.trf.xlu2  ;;  %v560_v26 = vpop.trf.xlu0 }
 0x38f   :  { %1079 = vmatmul.msk.f32.gmra.mxu3 %vm610_vm4, %v594_v25  ;;  %1061 = vmatmul.msk.f32.gmra.mxu1 %vm610_vm4, %v560_v26 }
 0x396   :  { %v595_v27 = vpop.trf.xlu2  ;;  %v561_v28 = vpop.trf.xlu0 }
 0x397   :  { %1080 = vmatmul.msk.f32.gmra.mxu3 %vm610_vm4, %v595_v27  ;;  %1062 = vmatmul.msk.f32.gmra.mxu1 %vm610_vm4, %v561_v28 }
 0x39e   :  { %v596_v29 = vpop.trf.xlu2  ;;  %v562_v30 = vpop.trf.xlu0 }
 0x39f   :  { %1081 = vmatmul.msk.f32.gmra.mxu3 %vm610_vm4, %v596_v29  ;;  %1063 = vmatmul.msk.f32.vlgmr.msrb.gmra.mxu2 %vm610_vm4, %v562_v30 }
 0x3a6   :  { %v597_v31 = vpop.trf.xlu2  ;;  %v563_v32 = vpop.trf.xlu0 }
 0x3a7   :  { %1082 = vmatmul.msk.f32.gmra.mxu3 %vm610_vm4, %v597_v31  ;;  %1064 = vmatmul.msk.f32.gmra.mxu2 %vm610_vm4, %v563_v32 }
 0x3ae   :  { %v598_v33 = vpop.trf.xlu2  ;;  %v564_v34 = vpop.trf.xlu0 }
 0x3af   :  { %1083 = vmatmul.msk.f32.gmra.mxu3 %vm610_vm4, %v598_v33  ;;  %1065 = vmatmul.msk.f32.gmra.mxu2 %vm610_vm4, %v564_v34 }
 0x3b6   :  { %v599_v35 = vpop.trf.xlu2  ;;  %v565_v36 = vpop.trf.xlu0 }
 0x3b7   :  { %1084 = vmatmul.msk.f32.gmra.mxu3 %vm610_vm4, %v599_v35  ;;  %1066 = vmatmul.msk.f32.gmra.mxu2 %vm610_vm4, %v565_v36 }
 0x3be   :  { %v600_v37 = vpop.trf.xlu2  ;;  %v566_v38 = vpop.trf.xlu0 }
 0x3bf   :  { %1085 = vmatmul.msk.f32.gmra.mxu3 %vm610_vm4, %v600_v37  ;;  %1067 = vmatmul.msk.f32.gmra.mxu2 %vm610_vm4, %v566_v38 }
 0x3c6   :  { %v601_v39 = vpop.trf.xlu2  ;;  %v567_v40 = vpop.trf.xlu0 }
 0x3c7   :  { %1086 = vmatmul.msk.f32.gmra.mxu3 %vm610_vm4, %v601_v39  ;;  %1068 = vmatmul.msk.f32.gmra.mxu2 %vm610_vm4, %v567_v40 }
 0x3ce   :  { %v602_v41 = vpop.trf.xlu2  ;;  %v568_v42 = vpop.trf.xlu0 }
 0x3cf   :  { %1087 = vmatmul.msk.f32.gmra.mxu3 %vm610_vm4, %v602_v41  ;;  %1069 = vmatmul.msk.f32.gmra.mxu2 %vm610_vm4, %v568_v42 }
 0x3d6   :  { %v603_v43 = vpop.trf.xlu2  ;;  %v569_v44 = vpop.trf.xlu0 }
 0x3d7   :  { %1088 = vmatmul.msk.f32.gmra.mxu3 %vm610_vm4, %v603_v43  ;;  %1070 = vmatmul.msk.f32.gmra.mxu2 %vm610_vm4, %v569_v44 }
 0x3de   :  { %v604_v45 = vpop.trf.xlu2  ;;  %v570_v46 = vpop.trf.xlu0 }
 0x3df   :  { %1089 = vmatmul.msk.f32.gmra.mxu3 %vm610_vm4, %v604_v45  ;;  %1071 = vmatmul.msk.f32.gmra.mxu2 %vm610_vm4, %v570_v46 }
 0x3e6   :  { %v571_v49 = vpop.trf.xlu0 }
 0x3e7   :  { %1072 = vmatmul.msk.f32.gmra.mxu2 %vm610_vm4, %v571_v49 }
 0x3ea   :  { %v772_v51 = vpop.f32.mrf.mxu3 }
 0x3eb   :  { %v773_v52 = vadd.f32 %v772_v51, %v1437_v50 }
 0x3ed   :  { %837 = vst.msk [vmem:[#allocation2 + $0x80] sm:$0xff] %vm820_vm5, %v773_v52 }
 0x3ee   :  { %v572_v53 = vpop.trf.xlu0 }
 0x3ef   :  { %1073 = vmatmul.msk.f32.gmra.mxu2 %vm610_vm4, %v572_v53 }
 0x3f2   :  { %v775_v54 = vpop.f32.mrf.mxu3 }
 0x3f3   :  { %v776_v55 = vadd.f32 %v775_v54, %v1437_v50 }
 0x3f4   :  { %v963_v56 = vld [vmem:[#allocation2 + $0x80] sm:$0xff]  ;;  %v724_v57 = vpop.f32.mrf.mxu1 }
 0x3f5   :  { %964 = vst [vmem:[%s1567_s2 + $0x80] sm:$0xff] %v963_v56  ;;  %v725_v58 = vadd.f32 %v724_v57, %v1437_v50 }
 0x3f6   :  { %838 = vst.msk [vmem:[#allocation2 + $0x88] sm:$0xff] %vm820_vm5, %v776_v55 }
 0x3f7   :  { %821 = vst.msk [vmem:[#allocation2] sm:$0xff] %vm820_vm5, %v725_v58 }
 0x3fa   :  { %v778_v59 = vpop.f32.mrf.mxu3 }
 0x3fb   :  { %v779_v60 = vadd.f32 %v778_v59, %v1437_v50 }
 0x3fc   :  { %v727_v61 = vpop.f32.mrf.mxu1 }
 0x3fd   :  { %v965_v62 = vld [vmem:[#allocation2 + $0x88] sm:$0xff]  ;;  %839 = vst.msk [vmem:[#allocation2 + $0x90] sm:$0xff] %vm820_vm5, %v779_v60  ;;  %v728_v63 = vadd.f32 %v727_v61, %v1437_v50 }
 0x3fe   :  { %966 = vst [vmem:[%s1567_s2 + $0x88] sm:$0xff] %v965_v62  ;;  %v931_v0 = vld [vmem:[#allocation2] sm:$0xff] }
 0x3ff   :  { %932 = vst [vmem:[%s1567_s2] sm:$0xff] %v931_v0 }
 0x400   :  { %822 = vst.msk [vmem:[#allocation2 + $0x8] sm:$0xff] %vm820_vm5, %v728_v63 }
 0x402   :  { %v781_v1 = vpop.f32.mrf.mxu3 }
 0x403   :  { %v782_v2 = vadd.f32 %v781_v1, %v1437_v50 }
 0x404   :  { %v967_v4 = vld [vmem:[#allocation2 + $0x90] sm:$0xff]  ;;  %v730_v7 = vpop.f32.mrf.mxu1 }
 0x405   :  { %968 = vst [vmem:[%s1567_s2 + $0x90] sm:$0xff] %v967_v4  ;;  %v731_v8 = vadd.f32 %v730_v7, %v1437_v50 }
 0x406   :  { %840 = vst.msk [vmem:[#allocation2 + $0x98] sm:$0xff] %vm820_vm5, %v782_v2 }
 0x407   :  { %v933_v5 = vld [vmem:[#allocation2 + $0x8] sm:$0xff]  ;;  %823 = vst.msk [vmem:[#allocation2 + $0x10] sm:$0xff] %vm820_vm5, %v731_v8 }
 0x408   :  { %934 = vst [vmem:[%s1567_s2 + $0x8] sm:$0xff] %v933_v5 }
 0x40a   :  { %v784_v6 = vpop.f32.mrf.mxu3 }
 0x40b   :  { %v785_v9 = vadd.f32 %v784_v6, %v1437_v50 }
 0x40c   :  { %v733_v10 = vpop.f32.mrf.mxu1 }
 0x40d   :  { %v969_v11 = vld [vmem:[#allocation2 + $0x98] sm:$0xff]  ;;  %841 = vst.msk [vmem:[#allocation2 + $0xa0] sm:$0xff] %vm820_vm5, %v785_v9  ;;  %v734_v12 = vadd.f32 %v733_v10, %v1437_v50 }
 0x40e   :  { %970 = vst [vmem:[%s1567_s2 + $0x98] sm:$0xff] %v969_v11  ;;  %v935_v13 = vld [vmem:[#allocation2 + $0x10] sm:$0xff] }
 0x40f   :  { %936 = vst [vmem:[%s1567_s2 + $0x10] sm:$0xff] %v935_v13 }
 0x410   :  { %824 = vst.msk [vmem:[#allocation2 + $0x18] sm:$0xff] %vm820_vm5, %v734_v12 }
 0x412   :  { %v787_v14 = vpop.f32.mrf.mxu3 }
 0x413   :  { %v788_v15 = vadd.f32 %v787_v14, %v1437_v50 }
 0x414   :  { %v971_v3 = vld [vmem:[#allocation2 + $0xa0] sm:$0xff]  ;;  %v736_v16 = vpop.f32.mrf.mxu1 }
 0x415   :  { %972 = vst [vmem:[%s1567_s2 + $0xa0] sm:$0xff] %v971_v3  ;;  %v737_v17 = vadd.f32 %v736_v16, %v1437_v50 }
 0x416   :  { %842 = vst.msk [vmem:[#allocation2 + $0xa8] sm:$0xff] %vm820_vm5, %v788_v15 }
 0x417   :  { %v937_v18 = vld [vmem:[#allocation2 + $0x18] sm:$0xff]  ;;  %825 = vst.msk [vmem:[#allocation2 + $0x20] sm:$0xff] %vm820_vm5, %v737_v17 }
 0x418   :  { %938 = vst [vmem:[%s1567_s2 + $0x18] sm:$0xff] %v937_v18 }
 0x41a   :  { %v790_v19 = vpop.f32.mrf.mxu3 }
 0x41b   :  { %v791_v20 = vadd.f32 %v790_v19, %v1437_v50 }
 0x41d   :  { %v973_v21 = vld [vmem:[#allocation2 + $0xa8] sm:$0xff]  ;;  %843 = vst.msk [vmem:[#allocation2 + $0xb0] sm:$0xff] %vm820_vm5, %v791_v20 }
 0x41e   :  { %974 = vst [vmem:[%s1567_s2 + $0xa8] sm:$0xff] %v973_v21  ;;  %v939_v22 = vld [vmem:[#allocation2 + $0x20] sm:$0xff] }
 0x41f   :  { %940 = vst [vmem:[%s1567_s2 + $0x20] sm:$0xff] %v939_v22 }
 0x422   :  { %v793_v23 = vpop.f32.mrf.mxu3  ;;  %v739_v24 = vpop.f32.mrf.mxu2 }
 0x423   :  { %v794_v25 = vadd.f32 %v793_v23, %v1437_v50  ;;  %v740_v26 = vadd.f32 %v739_v24, %v1437_v50 }
 0x424   :  { %v975_v27 = vld [vmem:[#allocation2 + $0xb0] sm:$0xff] }
 0x425   :  { %976 = vst [vmem:[%s1567_s2 + $0xb0] sm:$0xff] %v975_v27 }
 0x426   :  { %826 = vst.msk [vmem:[#allocation2 + $0x28] sm:$0xff] %vm820_vm5, %v740_v26 }
 0x427   :  { %844 = vst.msk [vmem:[#allocation2 + $0xb8] sm:$0xff] %vm820_vm5, %v794_v25 }
 0x42a   :  { %v796_v28 = vpop.f32.mrf.mxu3  ;;  %v742_v29 = vpop.f32.mrf.mxu2 }
 0x42b   :  { %v797_v30 = vadd.f32 %v796_v28, %v1437_v50  ;;  %v743_v31 = vadd.f32 %v742_v29, %v1437_v50 }
 0x42d   :  { %v941_v32 = vld [vmem:[#allocation2 + $0x28] sm:$0xff]  ;;  %845 = vst.msk [vmem:[#allocation2 + $0xc0] sm:$0xff] %vm820_vm5, %v797_v30 }
 0x42e   :  { %942 = vst [vmem:[%s1567_s2 + $0x28] sm:$0xff] %v941_v32  ;;  %v977_v33 = vld [vmem:[#allocation2 + $0xb8] sm:$0xff] }
 0x42f   :  { %827 = vst.msk [vmem:[#allocation2 + $0x30] sm:$0xff] %vm820_vm5, %v743_v31 }
 0x430   :  { %978 = vst [vmem:[%s1567_s2 + $0xb8] sm:$0xff] %v977_v33 }
 0x432   :  { %v799_v34 = vpop.f32.mrf.mxu3  ;;  %v745_v35 = vpop.f32.mrf.mxu2 }
 0x433   :  { %v746_v36 = vadd.f32 %v745_v35, %v1437_v50 }
 0x434   :  { %v979_v37 = vld [vmem:[#allocation2 + $0xc0] sm:$0xff] }
 0x435   :  { %980 = vst [vmem:[%s1567_s2 + $0xc0] sm:$0xff] %v979_v37 }
 0x436   :  { %v943_v38 = vld [vmem:[#allocation2 + $0x30] sm:$0xff]  ;;  %828 = vst.msk [vmem:[#allocation2 + $0x38] sm:$0xff] %vm820_vm5, %v746_v36 }
 0x437   :  { %944 = vst [vmem:[%s1567_s2 + $0x30] sm:$0xff] %v943_v38 }
 0x43a   :  { %v802_v39 = vpop.f32.mrf.mxu3  ;;  %v748_v40 = vpop.f32.mrf.mxu2 }
 0x43b   :  { %v749_v41 = vadd.f32 %v748_v40, %v1437_v50 }
 0x43d   :  { %v945_v42 = vld [vmem:[#allocation2 + $0x38] sm:$0xff]  ;;  %829 = vst.msk [vmem:[#allocation2 + $0x40] sm:$0xff] %vm820_vm5, %v749_v41 }
 0x43e   :  { %946 = vst [vmem:[%s1567_s2 + $0x38] sm:$0xff] %v945_v42 }
 0x442   :  { %v805_v43 = vpop.f32.mrf.mxu3  ;;  %v751_v44 = vpop.f32.mrf.mxu2 }
 0x443   :  { %v752_v45 = vadd.f32 %v751_v44, %v1437_v50 }
 0x444   :  { %v947_v46 = vld [vmem:[#allocation2 + $0x40] sm:$0xff] }
 0x445   :  { %830 = vst.msk [vmem:[#allocation2 + $0x48] sm:$0xff] %vm820_vm5, %v752_v45 }
 0x446   :  { %948 = vst [vmem:[%s1567_s2 + $0x40] sm:$0xff] %v947_v46 }
 0x44a   :  { %v808_v47 = vpop.f32.mrf.mxu3  ;;  %v754_v48 = vpop.f32.mrf.mxu2 }
 0x44b   :  { %v755_v49 = vadd.f32 %v754_v48, %v1437_v50 }
 0x44c   :  { %v949_v51 = vld [vmem:[#allocation2 + $0x48] sm:$0xff] }
 0x44d   :  { %950 = vst [vmem:[%s1567_s2 + $0x48] sm:$0xff] %v949_v51 }
 0x44e   :  { %831 = vst.msk [vmem:[#allocation2 + $0x50] sm:$0xff] %vm820_vm5, %v755_v49 }
 0x452   :  { %v811_v52 = vpop.f32.mrf.mxu3  ;;  %v757_v53 = vpop.f32.mrf.mxu2 }
 0x453   :  { %v758_v54 = vadd.f32 %v757_v53, %v1437_v50 }
 0x455   :  { %v951_v55 = vld [vmem:[#allocation2 + $0x50] sm:$0xff]  ;;  %832 = vst.msk [vmem:[#allocation2 + $0x58] sm:$0xff] %vm820_vm5, %v758_v54 }
 0x456   :  { %952 = vst [vmem:[%s1567_s2 + $0x50] sm:$0xff] %v951_v55 }
 0x45a   :  { %v814_v56 = vpop.f32.mrf.mxu3  ;;  %v760_v57 = vpop.f32.mrf.mxu2 }
 0x45b   :  { %v761_v58 = vadd.f32 %v760_v57, %v1437_v50 }
 0x45c   :  { %v953_v59 = vld [vmem:[#allocation2 + $0x58] sm:$0xff] }
 0x45d   :  { %954 = vst [vmem:[%s1567_s2 + $0x58] sm:$0xff] %v953_v59 }
 0x45e   :  { %833 = vst.msk [vmem:[#allocation2 + $0x60] sm:$0xff] %vm820_vm5, %v761_v58 }
 0x462   :  { %v817_v60 = vpop.f32.mrf.mxu3  ;;  %v763_v61 = vpop.f32.mrf.mxu2 }
 0x463   :  { %v764_v62 = vadd.f32 %v763_v61, %v1437_v50 }
 0x465   :  { %v955_v63 = vld [vmem:[#allocation2 + $0x60] sm:$0xff]  ;;  %834 = vst.msk [vmem:[#allocation2 + $0x68] sm:$0xff] %vm820_vm5, %v764_v62 }
 0x466   :  { %956 = vst [vmem:[%s1567_s2 + $0x60] sm:$0xff] %v955_v63 }
 0x46a   :  { %v766_v0 = vpop.f32.mrf.mxu2 }
 0x46b   :  { %v767_v1 = vadd.f32 %v766_v0, %v1437_v50 }
 0x46c   :  { %v957_v2 = vld [vmem:[#allocation2 + $0x68] sm:$0xff] }
 0x46d   :  { %958 = vst [vmem:[%s1567_s2 + $0x68] sm:$0xff] %v957_v2 }
 0x46e   :  { %835 = vst.msk [vmem:[#allocation2 + $0x70] sm:$0xff] %vm820_vm5, %v767_v1 }
 0x472   :  { %v769_v4 = vpop.f32.mrf.mxu2 }
 0x473   :  { %v770_v7 = vadd.f32 %v769_v4, %v1437_v50 }
 0x475   :  { %v959_v8 = vld [vmem:[#allocation2 + $0x70] sm:$0xff]  ;;  %836 = vst.msk [vmem:[#allocation2 + $0x78] sm:$0xff] %vm820_vm5, %v770_v7 }
 0x476   :  { %960 = vst [vmem:[%s1567_s2 + $0x70] sm:$0xff] %v959_v8 }
 0x47c   :  { %v961_v5 = vld [vmem:[#allocation2 + $0x78] sm:$0xff] }
 0x47d   :  { %962 = vst [vmem:[%s1567_s2 + $0x78] sm:$0xff] %v961_v5 }

</bundles_post_ra>
